<compile_context>
chip_gen: v6e
topology: v6e:2x2x1
jax: 0.10.0
libtpu: 0.0.40
codegen_flags: <defaults>
</compile_context>

<pallas_src>
import jax
import jax.numpy as jnp
from jax.experimental import pallas as pl
from jax.experimental.pallas import tpu as pltpu


def _round_up(x, m):
    return (x + m - 1) // m * m


# ----------------------------------------------------------------------------
# Fused kernel factory.
#   inputs : a, p, n K-slices (B, tk) bf16 ; w1 slice (tk, H) bf16 ;
#            b1 (1, H) f32 ; w2 (H, E_pad) bf16 ; b2 (1, E_pad) f32
#   outputs: emb (M_pad, E_pad) f32 ; dist slab (M_pad, 128) f32
#   scratch: x_stack (M_pad, tk) bf16 ; acc (M_pad, H) f32
# ----------------------------------------------------------------------------
def make_fused_kernel(B, E, E_pad, M_pad, num_k):
    def kernel(a_ref, p_ref, n_ref, w1_ref, b1_ref, w2_ref, b2_ref,
               emb_ref, dist_ref, x_stack, acc_ref):
        k = pl.program_id(0)

        @pl.when(k == 0)
        def _():
            acc_ref[...] = jnp.zeros_like(acc_ref)
            if M_pad > 3 * B:  # trace-time constant; pad rows stay zero forever
                x_stack[3 * B:, :] = jnp.zeros(
                    (M_pad - 3 * B, x_stack.shape[1]), x_stack.dtype)

        # assemble the stacked [a; p; n] K-slice in VMEM (no wrapper concat)
        x_stack[0 * B:1 * B, :] = a_ref[...]
        x_stack[1 * B:2 * B, :] = p_ref[...]
        x_stack[2 * B:3 * B, :] = n_ref[...]

        # first matmul: bf16 operands, f32 accumulation over the K grid axis
        acc_ref[...] += jnp.dot(x_stack[...], w1_ref[...],
                                preferred_element_type=jnp.float32)

        @pl.when(k == num_k - 1)
        def _():
            # epilogue runs once: bias + ReLU + second matmul + distances
            h = jnp.maximum(acc_ref[...] + b1_ref[...], 0.0)          # (M_pad, H) f32
            emb = jnp.dot(h.astype(jnp.bfloat16), w2_ref[...],
                          preferred_element_type=jnp.float32) + b2_ref[...]
            emb_ref[...] = emb                                         # full-lane store

            ea = emb[0 * B:1 * B, :]
            ep = emb[1 * B:2 * B, :]
            en = emb[2 * B:3 * B, :]
            # +eps only on the real embedding lanes (padded lanes stay exactly 0)
            lane = jax.lax.broadcasted_iota(jnp.int32, (B, E_pad), 1)
            eps_vec = jnp.where(lane < E, 1e-6, 0.0).astype(jnp.float32)
            dp = ea - ep + eps_vec
            dn = ea - en + eps_vec
            dist_p = jnp.sqrt(jnp.sum(dp * dp, axis=-1, keepdims=True))  # (B, 1)
            dist_n = jnp.sqrt(jnp.sum(dn * dn, axis=-1, keepdims=True))  # (B, 1)
            # lane-dense direct row-slice stores; rows [2B, M_pad) are unwritten
            # (never read by the wrapper).
            dist_ref[0 * B:1 * B, :] = jnp.broadcast_to(dist_p, (B, 128))
            dist_ref[1 * B:2 * B, :] = jnp.broadcast_to(dist_n, (B, 128))

    return kernel


# ----------------------------------------------------------------------------
# tripletnet.forward(a, p, n)
# ----------------------------------------------------------------------------
def tripletnet_forward(a, p, n, params, *, tk=512):
    w1, b1, w2, b2 = params
    B = a.shape[0]
    D, H = w1.shape
    E = w2.shape[1]

    M = 3 * B
    M_pad = _round_up(max(M, 8), 8)          # sublane multiple of 8
    E_pad = _round_up(E, 128)                # lane multiple of 128

    # K tile: lane-aligned, no larger than (padded) D
    tk = min(_round_up(tk, 128), _round_up(D, 128))
    D_pad = _round_up(D, tk)
    num_k = D_pad // tk

    # bf16 for the big streamed operands (metadata-only reshape, then cast)
    af = a.reshape(B, -1).astype(jnp.bfloat16)
    pf = p.reshape(B, -1).astype(jnp.bfloat16)
    nf = n.reshape(B, -1).astype(jnp.bfloat16)
    w1_b = w1.astype(jnp.bfloat16)
    if D_pad != D:
        kpad = ((0, 0), (0, D_pad - D))
        af, pf, nf = jnp.pad(af, kpad), jnp.pad(pf, kpad), jnp.pad(nf, kpad)
        w1_b = jnp.pad(w1_b, ((0, D_pad - D), (0, 0)))
    w2_b = jnp.pad(w2, ((0, 0), (0, E_pad - E))).astype(jnp.bfloat16)
    b1_f = b1.astype(jnp.float32)
    b2_f = jnp.pad(b2, ((0, 0), (0, E_pad - E))).astype(jnp.float32)

    # VMEM budget computed from the actual footprint (not a blanket 32 MiB)
    streamed = 2 * (3 * B * tk + tk * H) * 2                       # bf16, double-buffered
    resident = (H * E_pad * 2 + (H + E_pad) * 4                    # w2, b1, b2
                + 2 * (M_pad * E_pad + M_pad * 128) * 4            # outputs (x2 buffers)
                + M_pad * tk * 2 + M_pad * H * 4)                  # scratch
    vmem_bytes = min(streamed + resident + (8 << 20), 64 << 20)    # headroom, v7x cap

    kernel = make_fused_kernel(B, E, E_pad, M_pad, num_k)

    emb_pad, dist_block = pl.pallas_call(
        kernel,
        out_shape=(
            jax.ShapeDtypeStruct((M_pad, E_pad), jnp.float32),
            jax.ShapeDtypeStruct((M_pad, 128), jnp.float32),
        ),
        grid=(num_k,),
        in_specs=[
            pl.BlockSpec((B, tk), lambda k: (0, k)),       # a
            pl.BlockSpec((B, tk), lambda k: (0, k)),       # p
            pl.BlockSpec((B, tk), lambda k: (0, k)),       # n
            pl.BlockSpec((tk, H), lambda k: (k, 0)),       # w1
            pl.BlockSpec((1, H), lambda k: (0, 0)),        # b1
            pl.BlockSpec((H, E_pad), lambda k: (0, 0)),    # w2
            pl.BlockSpec((1, E_pad), lambda k: (0, 0)),    # b2
        ],
        out_specs=(
            pl.BlockSpec((M_pad, E_pad), lambda k: (0, 0)),   # resident across k
            pl.BlockSpec((M_pad, 128), lambda k: (0, 0)),
        ),
        scratch_shapes=[
            pltpu.VMEM((M_pad, tk), jnp.bfloat16),   # stacked x K-slice
            pltpu.VMEM((M_pad, H), jnp.float32),     # matmul-1 accumulator
        ],
        compiler_params=pltpu.CompilerParams(
            dimension_semantics=("arbitrary",),      # K is a reduction axis
            vmem_limit_bytes=int(vmem_bytes),
        ),
    )(af, pf, nf, w1_b, b1_f, w2_b, b2_f)

    embed_a = emb_pad[0 * B:1 * B, :E]
    embed_p = emb_pad[1 * B:2 * B, :E]
    embed_n = emb_pad[2 * B:3 * B, :E]
    dist_p = dist_block[0 * B:1 * B, 0]              # torch returns shape (B,)
    dist_n = dist_block[1 * B:2 * B, 0]
    return dist_p, dist_n, embed_a, embed_p, embed_n


def make_params(key, d_in, d_hidden, d_embed):
    k1, k2 = jax.random.split(key)
    # deterministic synthetic weights (tripletnet wraps an arbitrary `model`;
    # instantiated here as a 2-layer MLP)
    w1 = jax.random.normal(k1, (d_in, d_hidden), jnp.float32) * (1.0 / jnp.sqrt(d_in))
    b1 = jnp.zeros((1, d_hidden), jnp.float32)
    w2 = jax.random.normal(k2, (d_hidden, d_embed), jnp.float32) * (1.0 / jnp.sqrt(d_hidden))
    b2 = jnp.zeros((1, d_embed), jnp.float32)
    return (w1, b1, w2, b2)


if __name__ == "__main__":
    key = jax.random.PRNGKey(0)
    ka, kp, kn, kw = jax.random.split(key, 4)

    B, C, H_IMG, W_IMG = 2, 4, 16, 16   # NCHW, PyTorch convention
    D_IN = C * H_IMG * W_IMG            # 1024
    D_HIDDEN = 128
    D_EMBED = 64

    a = jax.random.normal(ka, (B, C, H_IMG, W_IMG), jnp.float32)
    p = jax.random.normal(kp, (B, C, H_IMG, W_IMG), jnp.float32)
    n = jax.random.normal(kn, (B, C, H_IMG, W_IMG), jnp.float32)

    params = make_params(kw, D_IN, D_HIDDEN, D_EMBED)

    fwd = jax.jit(lambda a, p, n: tripletnet_forward(a, p, n, params))
    dist_p, dist_n, embed_a, embed_p, embed_n = fwd(a, p, n)
    jax.block_until_ready((dist_p, dist_n, embed_a, embed_p, embed_n))

    # reference emulating the kernel's bf16 storage / f32 accumulation path;
    # tolerances are relaxed to 1e-2 because the MXU inputs are bf16.
    w1, b1, w2, b2 = params

    def _bf(x):
        return x.astype(jnp.bfloat16).astype(jnp.float32)

    def ref_embed(x):
        h = jnp.maximum(_bf(x.reshape(B, -1)) @ _bf(w1) + b1, 0.0)
        return _bf(h) @ _bf(w2) + b2

    ea, ep, en = ref_embed(a), ref_embed(p), ref_embed(n)
    eps = 1e-6
    rdp = jnp.sqrt(jnp.sum((ea - ep + eps) ** 2, axis=-1))
    rdn = jnp.sqrt(jnp.sum((ea - en + eps) ** 2, axis=-1))

    assert dist_p.shape == (B,) and dist_n.shape == (B,)
    assert embed_a.shape == (B, D_EMBED)
    assert embed_p.shape == (B, D_EMBED) and embed_n.shape == (B, D_EMBED)
    assert jnp.allclose(embed_a, ea, atol=1e-2, rtol=1e-2)
    assert jnp.allclose(embed_p, ep, atol=1e-2, rtol=1e-2)
    assert jnp.allclose(embed_n, en, atol=1e-2, rtol=1e-2)
    assert jnp.allclose(dist_p, rdp, atol=1e-2, rtol=1e-2)
    assert jnp.allclose(dist_n, rdn, atol=1e-2, rtol=1e-2)

    print("KERNEL_OK")
</pallas_src>

<mosaic_0001>
module attributes {stable_mosaic.version = 11 : i64} {
  func.func @kernel(%arg0: i32, %arg1: memref<2x512xbf16, #tpu.memory_space<vmem>>, %arg2: memref<2x512xbf16, #tpu.memory_space<vmem>>, %arg3: memref<2x512xbf16, #tpu.memory_space<vmem>>, %arg4: memref<512x128xbf16, #tpu.memory_space<vmem>>, %arg5: memref<1x128xf32, #tpu.memory_space<vmem>>, %arg6: memref<128x128xbf16, #tpu.memory_space<vmem>>, %arg7: memref<1x128xf32, #tpu.memory_space<vmem>>, %arg8: memref<8x128xf32, #tpu.memory_space<vmem>>, %arg9: memref<8x128xf32, #tpu.memory_space<vmem>>, %arg10: memref<8x512xbf16, #tpu.memory_space<vmem>>, %arg11: memref<8x128xf32, #tpu.memory_space<vmem>>) attributes {dimension_semantics = [#tpu.dimension_semantics<arbitrary>], iteration_bounds = array<i64: 2>, scalar_prefetch = 0 : i64, scratch_operands = 2 : i64, tpu.core_type = #tpu.core_type<tc>, window_params = [{transform_indices = @transform_0, window_bounds = array<i64: 2, 512>}, {transform_indices = @transform_1, window_bounds = array<i64: 2, 512>}, {transform_indices = @transform_2, window_bounds = array<i64: 2, 512>}, {transform_indices = @transform_3, window_bounds = array<i64: 512, 128>}, {pipeline_mode = #tpu.pipeline_mode<synchronous>, transform_indices = @transform_4, window_bounds = array<i64: 1, 128>}, {pipeline_mode = #tpu.pipeline_mode<synchronous>, transform_indices = @transform_5, window_bounds = array<i64: 128, 128>}, {pipeline_mode = #tpu.pipeline_mode<synchronous>, transform_indices = @transform_6, window_bounds = array<i64: 1, 128>}, {pipeline_mode = #tpu.pipeline_mode<synchronous>, transform_indices = @transform_7, window_bounds = array<i64: 8, 128>}, {pipeline_mode = #tpu.pipeline_mode<synchronous>, transform_indices = @transform_8, window_bounds = array<i64: 8, 128>}]} {
    %c0_i32 = arith.constant 0 : i32
    %0 = arith.cmpi eq, %arg0, %c0_i32 : i32
    %1 = arith.extui %0 : i1 to i32
    %c0_i32_0 = arith.constant 0 : i32
    %2 = arith.cmpi ne, %1, %c0_i32_0 : i32
    scf.if %2 {
      %cst_19 = arith.constant 0.000000e+00 : f32
      %18 = vector.broadcast %cst_19 : f32 to vector<8x128xf32>
      %c0_20 = arith.constant 0 : index
      %c0_21 = arith.constant 0 : index
      %19 = vector.load %arg11[%c0_20, %c0_21] : memref<8x128xf32, #tpu.memory_space<vmem>>, vector<8x128xf32>
      tpu.vector_store %arg11[%c0_20, %c0_21], %18 {strides = array<i32>} : memref<8x128xf32, #tpu.memory_space<vmem>>, vector<8x128xf32>,
      %cst_22 = arith.constant 0.000000e+00 : bf16
      %20 = vector.broadcast %cst_22 : bf16 to vector<2x512xbf16>
      %c6 = arith.constant 6 : index
      %c0_23 = arith.constant 0 : index
      %21 = vector.load %arg10[%c6, %c0_23] : memref<8x512xbf16, #tpu.memory_space<vmem>>, vector<2x512xbf16>
      tpu.vector_store %arg10[%c6, %c0_23], %20 {strides = array<i32>} : memref<8x512xbf16, #tpu.memory_space<vmem>>, vector<2x512xbf16>,
    } else {
    }
    %c0 = arith.constant 0 : index
    %c0_1 = arith.constant 0 : index
    %3 = vector.load %arg1[%c0, %c0_1] : memref<2x512xbf16, #tpu.memory_space<vmem>>, vector<2x512xbf16>
    %c0_2 = arith.constant 0 : index
    %c0_3 = arith.constant 0 : index
    %4 = vector.load %arg10[%c0_2, %c0_3] : memref<8x512xbf16, #tpu.memory_space<vmem>>, vector<2x512xbf16>
    tpu.vector_store %arg10[%c0_2, %c0_3], %3 {strides = array<i32>} : memref<8x512xbf16, #tpu.memory_space<vmem>>, vector<2x512xbf16>,
    %c0_4 = arith.constant 0 : index
    %c0_5 = arith.constant 0 : index
    %5 = vector.load %arg2[%c0_4, %c0_5] : memref<2x512xbf16, #tpu.memory_space<vmem>>, vector<2x512xbf16>
    %c2 = arith.constant 2 : index
    %c0_6 = arith.constant 0 : index
    %6 = vector.load %arg10[%c2, %c0_6] : memref<8x512xbf16, #tpu.memory_space<vmem>>, vector<2x512xbf16>
    tpu.vector_store %arg10[%c2, %c0_6], %5 {strides = array<i32>} : memref<8x512xbf16, #tpu.memory_space<vmem>>, vector<2x512xbf16>,
    %c0_7 = arith.constant 0 : index
    %c0_8 = arith.constant 0 : index
    %7 = vector.load %arg3[%c0_7, %c0_8] : memref<2x512xbf16, #tpu.memory_space<vmem>>, vector<2x512xbf16>
    %c4 = arith.constant 4 : index
    %c0_9 = arith.constant 0 : index
    %8 = vector.load %arg10[%c4, %c0_9] : memref<8x512xbf16, #tpu.memory_space<vmem>>, vector<2x512xbf16>
    tpu.vector_store %arg10[%c4, %c0_9], %7 {strides = array<i32>} : memref<8x512xbf16, #tpu.memory_space<vmem>>, vector<2x512xbf16>,
    %c0_10 = arith.constant 0 : index
    %c0_11 = arith.constant 0 : index
    %9 = vector.load %arg11[%c0_10, %c0_11] : memref<8x128xf32, #tpu.memory_space<vmem>>, vector<8x128xf32>
    %c0_12 = arith.constant 0 : index
    %c0_13 = arith.constant 0 : index
    %10 = vector.load %arg10[%c0_12, %c0_13] : memref<8x512xbf16, #tpu.memory_space<vmem>>, vector<8x512xbf16>
    %c0_14 = arith.constant 0 : index
    %c0_15 = arith.constant 0 : index
    %11 = vector.load %arg4[%c0_14, %c0_15] : memref<512x128xbf16, #tpu.memory_space<vmem>>, vector<512x128xbf16>
    %cst = arith.constant dense<0.000000e+00> : vector<8x128xf32>
    %12 = tpu.matmul %10, %11, %cst {dimension_numbers = #tpu.dot_dimension_numbers<[1], [0], [0], [1], [0, 0, 1, 1], [], []>} : vector<8x512xbf16>, vector<512x128xbf16>, vector<8x128xf32> -> vector<8x128xf32>
    %13 = arith.addf %9, %12 : vector<8x128xf32>
    %c0_16 = arith.constant 0 : index
    %c0_17 = arith.constant 0 : index
    %14 = vector.load %arg11[%c0_16, %c0_17] : memref<8x128xf32, #tpu.memory_space<vmem>>, vector<8x128xf32>
    tpu.vector_store %arg11[%c0_16, %c0_17], %13 {strides = array<i32>} : memref<8x128xf32, #tpu.memory_space<vmem>>, vector<8x128xf32>,
    %c1_i32 = arith.constant 1 : i32
    %15 = arith.cmpi eq, %arg0, %c1_i32 : i32
    %16 = arith.extui %15 : i1 to i32
    %c0_i32_18 = arith.constant 0 : i32
    %17 = arith.cmpi ne, %16, %c0_i32_18 : i32
    scf.if %17 {
      %c0_19 = arith.constant 0 : index
      %c0_20 = arith.constant 0 : index
      %18 = vector.load %arg11[%c0_19, %c0_20] : memref<8x128xf32, #tpu.memory_space<vmem>>, vector<8x128xf32>
      %c0_21 = arith.constant 0 : index
      %c0_22 = arith.constant 0 : index
      %19 = vector.load %arg5[%c0_21, %c0_22] : memref<1x128xf32, #tpu.memory_space<vmem>>, vector<1x128xf32>
      %20 = vector.broadcast %19 : vector<1x128xf32> to vector<8x128xf32>
      %21 = arith.addf %18, %20 : vector<8x128xf32>
      %cst_23 = arith.constant 0.000000e+00 : f32
      %22 = vector.broadcast %cst_23 : f32 to vector<8x128xf32>
      %23 = arith.maximumf %21, %22 : vector<8x128xf32>
      %24 = arith.truncf %23 : vector<8x128xf32> to vector<8x128xbf16>
      %c0_24 = arith.constant 0 : index
      %c0_25 = arith.constant 0 : index
      %25 = vector.load %arg6[%c0_24, %c0_25] : memref<128x128xbf16, #tpu.memory_space<vmem>>, vector<128x128xbf16>
      %cst_26 = arith.constant dense<0.000000e+00> : vector<8x128xf32>
      %26 = tpu.matmul %24, %25, %cst_26 {dimension_numbers = #tpu.dot_dimension_numbers<[1], [0], [0], [1], [0, 0, 1, 1], [], []>} : vector<8x128xbf16>, vector<128x128xbf16>, vector<8x128xf32> -> vector<8x128xf32>
      %c0_27 = arith.constant 0 : index
      %c0_28 = arith.constant 0 : index
      %27 = vector.load %arg7[%c0_27, %c0_28] : memref<1x128xf32, #tpu.memory_space<vmem>>, vector<1x128xf32>
      %28 = vector.broadcast %27 : vector<1x128xf32> to vector<8x128xf32>
      %29 = arith.addf %26, %28 : vector<8x128xf32>
      %c0_29 = arith.constant 0 : index
      %c0_30 = arith.constant 0 : index
      %30 = vector.load %arg8[%c0_29, %c0_30] : memref<8x128xf32, #tpu.memory_space<vmem>>, vector<8x128xf32>
      tpu.vector_store %arg8[%c0_29, %c0_30], %29 {strides = array<i32>} : memref<8x128xf32, #tpu.memory_space<vmem>>, vector<8x128xf32>,
      %31 = vector.extract_strided_slice %29 {offsets = [0, 0], sizes = [2, 128], strides = [1, 1]} : vector<8x128xf32> to vector<2x128xf32>
      %32 = vector.extract_strided_slice %29 {offsets = [2, 0], sizes = [2, 128], strides = [1, 1]} : vector<8x128xf32> to vector<2x128xf32>
      %33 = vector.extract_strided_slice %29 {offsets = [4, 0], sizes = [2, 128], strides = [1, 1]} : vector<8x128xf32> to vector<2x128xf32>
      %34 = tpu.iota {dimensions = array<i32: 1>} : vector<2x128xi32>
      %c64_i32 = arith.constant 64 : i32
      %35 = vector.broadcast %c64_i32 : i32 to vector<2x128xi32>
      %36 = arith.cmpi slt, %34, %35 : vector<2x128xi32>
      %cst_31 = arith.constant 9.99999997E-7 : f32
      %cst_32 = arith.constant 0.000000e+00 : f32
      %37 = vector.broadcast %cst_31 : f32 to vector<2x128xf32>
      %38 = vector.broadcast %cst_32 : f32 to vector<2x128xf32>
      %39 = arith.select %36, %37, %38 : vector<2x128xi1>, vector<2x128xf32>
      %40 = arith.subf %31, %32 : vector<2x128xf32>
      %41 = arith.addf %40, %39 : vector<2x128xf32>
      %42 = arith.subf %31, %33 : vector<2x128xf32>
      %43 = arith.addf %42, %39 : vector<2x128xf32>
      %44 = arith.mulf %41, %41 : vector<2x128xf32>
      %cst_33 = arith.constant dense<0.000000e+00> : vector<2xf32>
      %45 = vector.multi_reduction <add>, %44, %cst_33 [1] : vector<2x128xf32> to vector<2xf32>
      %46 = vector.shape_cast %45 : vector<2xf32> to vector<2x1xf32>
      %47 = math.sqrt %46 : vector<2x1xf32>
      %48 = arith.mulf %43, %43 : vector<2x128xf32>
      %cst_34 = arith.constant dense<0.000000e+00> : vector<2xf32>
      %49 = vector.multi_reduction <add>, %48, %cst_34 [1] : vector<2x128xf32> to vector<2xf32>
      %50 = vector.shape_cast %49 : vector<2xf32> to vector<2x1xf32>
      %51 = math.sqrt %50 : vector<2x1xf32>
      %52 = vector.shape_cast %47 : vector<2x1xf32> to vector<2x1xf32>
      %53 = vector.broadcast %52 : vector<2x1xf32> to vector<2x128xf32>
      %c0_35 = arith.constant 0 : index
      %c0_36 = arith.constant 0 : index
      %54 = vector.load %arg9[%c0_35, %c0_36] : memref<8x128xf32, #tpu.memory_space<vmem>>, vector<2x128xf32>
      tpu.vector_store %arg9[%c0_35, %c0_36], %53 {strides = array<i32>} : memref<8x128xf32, #tpu.memory_space<vmem>>, vector<2x128xf32>,
      %55 = vector.shape_cast %51 : vector<2x1xf32> to vector<2x1xf32>
      %56 = vector.broadcast %55 : vector<2x1xf32> to vector<2x128xf32>
      %c2_37 = arith.constant 2 : index
      %c0_38 = arith.constant 0 : index
      %57 = vector.load %arg9[%c2_37, %c0_38] : memref<8x128xf32, #tpu.memory_space<vmem>>, vector<2x128xf32>
      tpu.vector_store %arg9[%c2_37, %c0_38], %56 {strides = array<i32>} : memref<8x128xf32, #tpu.memory_space<vmem>>, vector<2x128xf32>,
    } else {
    }
    return
  }
  func.func @transform_0(%arg0: i32) -> (i32, i32) {
    %c0_i32 = arith.constant 0 : i32
    %c0_i32_0 = arith.constant 0 : i32
    return %c0_i32, %arg0 : i32, i32
  }
  func.func @transform_1(%arg0: i32) -> (i32, i32) {
    %c0_i32 = arith.constant 0 : i32
    %c0_i32_0 = arith.constant 0 : i32
    return %c0_i32, %arg0 : i32, i32
  }
  func.func @transform_2(%arg0: i32) -> (i32, i32) {
    %c0_i32 = arith.constant 0 : i32
    %c0_i32_0 = arith.constant 0 : i32
    return %c0_i32, %arg0 : i32, i32
  }
  func.func @transform_3(%arg0: i32) -> (i32, i32) {
    %c0_i32 = arith.constant 0 : i32
    %c0_i32_0 = arith.constant 0 : i32
    return %arg0, %c0_i32 : i32, i32
  }
  func.func @transform_4(%arg0: i32) -> (i32, i32) {
    %c0_i32 = arith.constant 0 : i32
    %c0_i32_0 = arith.constant 0 : i32
    %c0_i32_1 = arith.constant 0 : i32
    return %c0_i32, %c0_i32_0 : i32, i32
  }
  func.func @transform_5(%arg0: i32) -> (i32, i32) {
    %c0_i32 = arith.constant 0 : i32
    %c0_i32_0 = arith.constant 0 : i32
    %c0_i32_1 = arith.constant 0 : i32
    return %c0_i32, %c0_i32_0 : i32, i32
  }
  func.func @transform_6(%arg0: i32) -> (i32, i32) {
    %c0_i32 = arith.constant 0 : i32
    %c0_i32_0 = arith.constant 0 : i32
    %c0_i32_1 = arith.constant 0 : i32
    return %c0_i32, %c0_i32_0 : i32, i32
  }
  func.func @transform_7(%arg0: i32) -> (i32, i32) {
    %c0_i32 = arith.constant 0 : i32
    %c0_i32_0 = arith.constant 0 : i32
    %c0_i32_1 = arith.constant 0 : i32
    return %c0_i32, %c0_i32_0 : i32, i32
  }
  func.func @transform_8(%arg0: i32) -> (i32, i32) {
    %c0_i32 = arith.constant 0 : i32
    %c0_i32_0 = arith.constant 0 : i32
    %c0_i32_1 = arith.constant 0 : i32
    return %c0_i32, %c0_i32_0 : i32, i32
  }
}

</mosaic_0001>

<bundles_post_ra>
// kernel: _lambda_.1
= control target key start
LH: loop header
LB: loop body
LE: loop exit
PB: predicated region body
PF: predicated region fallthrough
CT: control target
= control target key end

     0   :  { %s1282_s27 = smov 0   ;;  %s1406_s0 = inlined_call_operand.vmem [shape: bf16[2,1024], index: 0, kind: input, shape index: {}]   ;;  %s1407_s1 = inlined_call_operand.vmem [shape: bf16[2,1024], index: 1, kind: input, shape index: {}]   ;;  %s1408_s2 = inlined_call_operand.vmem [shape: bf16[2,1024], index: 2, kind: input, shape index: {}]   ;;  %s1409_s3 = inlined_call_operand.vmem [shape: bf16[1024,128], index: 3, kind: input, shape index: {}]   ;;  %s1410_s4 = inlined_call_operand.vmem [shape: f32[1,128], index: 4, kind: input, shape index: {}]   ;;  %s1411_s5 = inlined_call_operand.vmem [shape: bf16[128,128], index: 5, kind: input, shape index: {}]   ;;  %s1412_s6 = inlined_call_operand.vmem [shape: f32[1,128], index: 6, kind: input, shape index: {}]   ;;  %s1413_s7 = inlined_call_operand.vmem [shape: f32[8,128], index: 7, kind: output, shape index: {0}]   ;;  %s1414_s8 = inlined_call_operand.vmem [shape: f32[8,128], index: 8, kind: output, shape index: {1}]  }
   0x1 LB: > { %s1288_s28 = sadd.s32 4294967295, %s1230_s27   ;;  %p1025_p0 = scmp.ge.s32.totalorder %s1230_s27, 1  ;;  %s1230_s27 = sphi %s1282_s27, %s19_s27  }
   0x2   : > { %p286_p1 = scmp.lt.s32.totalorder %s1230_s27, 3 }
   0x4   : > { %p287_p2 = pnand %p1025_p0, %p286_p1 }
   0x5   : > { %s1026_s29 = sshll.u32 (!%p287_p2), %s1288_s28, 2  ;;  %s1029_s30 = sshll.u32 (!%p287_p2), %s1288_s28, 6 }
   0x6   : > { %290 = sbr.rel (%p287_p2) target bundleno = 657 (0x291), region = 48  ;;  %p328_p3 = scmp.lt.s32.totalorder (!%p287_p2), %s1026_s29, 7 }
   0x7   : > { %p343_p4 = scmp.lt.s32.totalorder (!%p287_p2), %s1029_s30, 127  ;;  %p1031_p5 = scmp.ne.s32.totalorder (!%p287_p2), %s1288_s28, 0 }
   0xb   : > { %s1416_s29 = smov (!%p328_p3, %s1026_s29), 7  ;;  %s1418_s30 = smov (!%p343_p4, %s1029_s30), 127 }
   0xc   : > { %s330_s11 = scalar_lea.vmem %s1406_s0, %s1416_s29  ;;  %s335_s14 = scalar_lea.vmem %s1407_s1, %s1416_s29 }
   0xd   : > { %s340_s17 = scalar_lea.vmem %s1408_s2, %s1416_s29  ;;  %s1030_s18 = sshll.u32 %s1418_s30, 2 }
   0xe   : > { %s1311_s21 = scalar_lea.vmem %s1409_s3, %s1030_s18  ;;  %352 = sbr.rel (%p1031_p5) target bundleno = 22 (0x16), region = 52 }
  0x13   : > { %v1232_v0 = vmov 0.0   ;;  %v1233_v1 = vmov 0  }
  0x14   : > { %353 = vst [vmem:[#allocation3] sm:$0xff] %v1232_v0  ;;  %354 = vst [vmem:[#allocation2] sm:$0x88] %v1233_v1 }
  0x15   : > { %355 = vst [vmem:[#allocation2 + $0x8] sm:$0x88] %v1233_v1 }
  0x16 PF: > { %v1175_v2 = vld [vmem:[%s1311_s21 + $0x78] sm:$0xff]   ;;  %v1179_v6 = vld [vmem:[%s1311_s21 + $0x70] sm:$0xff]   ;;  %v1183_v10 = vld [vmem:[%s1311_s21 + $0x68] sm:$0xff]   ;;  %v418_v34 = vlaneseq  ;;  %v1234_v39 = vmov 1935823168   ;;  %p1076_p6 = scmp.ne.s32.totalorder %s1288_s28, 1 }
  0x17   : > { %v1176_v3 = vld [vmem:[%s1311_s21 + $0xf8] sm:$0xff]   ;;  %1089 = vmatprep.subr.bf16.mxu0 %v1175_v2  ;;  %v1180_v7 = vld [vmem:[%s1311_s21 + $0xf0] sm:$0xff]   ;;  %v1184_v11 = vld [vmem:[%s1311_s21 + $0xe8] sm:$0xff]   ;;  %v416_v40 = vunpack.c.l.s4 %v1234_v39 }
  0x18   : > { %v1177_v4 = vld [vmem:[%s1311_s21 + $0x38] sm:$0xff]   ;;  %1111 = vmatprep.subr.bf16.mxu1 %v1176_v3  ;;  %v1181_v8 = vld [vmem:[%s1311_s21 + $0x30] sm:$0xff]   ;;  %v1185_v12 = vld [vmem:[%s1311_s21 + $0x28] sm:$0xff]   ;;  %v419_v41 = vshrl.u32 %v418_v34, 7 }
  0x19   : > { %v1178_v5 = vld [vmem:[%s1311_s21 + $0xb8] sm:$0xff]   ;;  %1090 = vmatpush3.bf16.msra.mxu0 %v1177_v4  ;;  %v1182_v9 = vld [vmem:[%s1311_s21 + $0xb0] sm:$0xff]   ;;  %v1186_v13 = vld [vmem:[%s1311_s21 + $0xa8] sm:$0xff]   ;;  %v417_v43 = vunpack.c.0.s8 %v416_v40 }
  0x1a   : > { %1112 = vmatpush3.bf16.msra.mxu1 %v1178_v5  ;;  %1091 = vmatprep.subr.bf16.mxu0 %v1179_v6  ;;  %v1187_v14 = vld [vmem:[%s1311_s21 + $0x60] sm:$0xff]   ;;  %v1191_v18 = vld [vmem:[%s1311_s21 + $0x58] sm:$0xff]   ;;  %v1195_v22 = vld [vmem:[%s1311_s21 + $0x50] sm:$0xff]  }
  0x1b   : > { %1113 = vmatprep.subr.bf16.mxu1 %v1180_v7  ;;  %v1188_v15 = vld [vmem:[%s1311_s21 + $0xe0] sm:$0xff]   ;;  %v1192_v19 = vld [vmem:[%s1311_s21 + $0xd8] sm:$0xff]   ;;  %v1196_v23 = vld [vmem:[%s1311_s21 + $0xd0] sm:$0xff]   ;;  %v420_v44 = vsub.s32 %v417_v43, %v419_v41 }
  0x1c   : > { %v1189_v16 = vld [vmem:[%s1311_s21 + $0x20] sm:$0xff]   ;;  %v1193_v20 = vld [vmem:[%s1311_s21 + $0x18] sm:$0xff]   ;;  %v1197_v24 = vld [vmem:[%s1311_s21 + $0x10] sm:$0xff]  }
  0x1d   : > { %1092 = vmatpush3.bf16.msra.mxu0 %v1181_v8  ;;  %v1190_v17 = vld [vmem:[%s1311_s21 + $0xa0] sm:$0xff]   ;;  %v1194_v21 = vld [vmem:[%s1311_s21 + $0x98] sm:$0xff]   ;;  %v1198_v25 = vld [vmem:[%s1311_s21 + $0x90] sm:$0xff]  }
  0x1e   : > { %1114 = vmatpush3.bf16.msra.mxu1 %v1182_v9  ;;  %1093 = vmatprep.subr.bf16.mxu0 %v1183_v10  ;;  %v1199_v26 = vld [vmem:[%s1311_s21 + $0x48] sm:$0xff]   ;;  %v1203_v30 = vld [vmem:[%s1311_s21 + $0x40] sm:$0xff]   ;;  %v441_v60 = vld [vmem:[#allocation3] sm:$0xff] }
  0x1f   : > { %1115 = vmatprep.subr.bf16.mxu1 %v1184_v11  ;;  %v1200_v27 = vld [vmem:[%s1311_s21 + $0xc8] sm:$0xff]   ;;  %v1204_v31 = vld [vmem:[%s1311_s21 + $0xc0] sm:$0xff]  }
  0x20   : > { %v1201_v28 = vld [vmem:[%s1311_s21 + $0x8] sm:$0xff]   ;;  %v1205_v32 = vld [vmem:[%s1311_s21] sm:$0xff]  }
  0x21   : > { %1094 = vmatpush3.bf16.msra.mxu0 %v1185_v12  ;;  %v1202_v29 = vld [vmem:[%s1311_s21 + $0x88] sm:$0xff]   ;;  %v1206_v33 = vld [vmem:[%s1311_s21 + $0x80] sm:$0xff]  }
  0x22   : > { %1116 = vmatpush3.bf16.msra.mxu1 %v1186_v13  ;;  %1095 = vmatprep.subr.bf16.mxu0 %v1187_v14  ;;  %v1032_v35 = vld.sshfl [vmem:[%s330_s11] sm:$0x55 pattern:$0x73625140] }
  0x23   : > { %1117 = vmatprep.subr.bf16.mxu1 %v1188_v15  ;;  %1033 = vst.sshfl [vmem:[#allocation2] sm:$0x5 pattern:$0x75316420] %v1032_v35  ;;  %v365_v37 = vcombine.high %v1032_v35, %v1032_v35  ;;  %v1207_v42 = vld [vmem:[%s340_s17] ss:$0 sps:$4 sm:$0xff]  }
  0x24   : > { %v1035_v36 = vld.sshfl [vmem:[%s335_s14] sm:$0x55 pattern:$0x73625140]  ;;  %v421_v45 = vrot.slane %v1207_v42, %v420_v44 }
  0x25   : > { %1096 = vmatpush3.bf16.msra.mxu0 %v1189_v16  ;;  %v393_v38 = vcombine.low %v1035_v36, %v1035_v36  ;;  %1037 = vst.sshfl [vmem:[#allocation2 + $0x8] sm:$0x50 pattern:$0x75316420] %v1035_v36 }
  0x26   : > { %1118 = vmatpush3.bf16.msra.mxu1 %v1190_v17  ;;  %1097 = vmatprep.subr.bf16.mxu0 %v1191_v18  ;;  %1034 = vst.sshfl [vmem:[#allocation2 + $0x8] sm:$0x5 pattern:$0x75316420] %v365_v37  ;;  %v422_v46 = vcombine.high %v421_v45, %v421_v45 }
  0x27   : > { %1119 = vmatprep.subr.bf16.mxu1 %v1192_v19  ;;  %1036 = vst.sshfl [vmem:[#allocation2] sm:$0x50 pattern:$0x75316420] %v393_v38 }
  0x28   : > { %1038 = vst.sshfl [vmem:[#allocation2] sm:$0xa pattern:$0x75316420] %v421_v45 }
  0x29   : > { %1098 = vmatpush3.bf16.msra.mxu0 %v1193_v20  ;;  %1039 = vst.sshfl [vmem:[#allocation2 + $0x8] sm:$0xa pattern:$0x75316420] %v422_v46 }
  0x2a   : > { %1120 = vmatpush3.bf16.msra.mxu1 %v1194_v21  ;;  %1099 = vmatprep.subr.bf16.mxu0 %v1195_v22 }
  0x2b   : > { %1121 = vmatprep.subr.bf16.mxu1 %v1196_v23 }
  0x2d   : > { %1100 = vmatpush3.bf16.msra.mxu0 %v1197_v24 }
  0x2e   : > { %1122 = vmatpush3.bf16.msra.mxu1 %v1198_v25  ;;  %1101 = vmatprep.subr.bf16.mxu0 %v1199_v26 }
  0x2f   : > { %1123 = vmatprep.subr.bf16.mxu1 %v1200_v27  ;;  %v442_v47 = vld [vmem:[#allocation2] sm:$0xff] }
  0x30   : > { %v1040_v48 = vcombine.low %v442_v47, %v442_v47  ;;  %v1041_v49 = vcombine.high %v442_v47, %v442_v47  ;;  %v443_v50 = vld [vmem:[#allocation2 + $0x8] sm:$0xff] }
  0x31   : > { %1102 = vmatpush3.bf16.msra.mxu0 %v1201_v28  ;;  %v1042_v51 = vcombine.low %v443_v50, %v443_v50  ;;  %v1043_v52 = vcombine.high %v443_v50, %v443_v50 }
  0x32   : > { %1124 = vmatpush3.bf16.msra.mxu1 %v1202_v29  ;;  %1103 = vmatprep.subr.bf16.mxu0 %v1203_v30 }
  0x33   : > { %1125 = vmatprep.subr.bf16.mxu1 %v1204_v31  ;;  %746 = vmatprep.mubr.bf16.mxu0 %v1041_v49 }
  0x34   : > { %786 = vmatprep.mubr.bf16.mxu1 %v1043_v52 }
  0x35   : > { %1104 = vmatpush3.bf16.msra.mxu0 %v1205_v32 }
  0x36   : > { %1126 = vmatpush3.bf16.msra.mxu1 %v1206_v33 }
  0x38   : > { %747 = vmatmul.mubr.bf16.vlgmr.msra.gmra.mxu0 %v1040_v48 }
  0x39   : > { %787 = vmatmul.mubr.bf16.vlgmr.msra.gmra.mxu1 %v1042_v51 }
  0xf8   : > { %v1105_v53 = vpop.f32.mrf.mxu0 }
  0xf9   : > { %v1127_v54 = vpop.f32.mrf.mxu1 }
  0xfa   : > { %v1106_v55 = vpop.f32.mrf.mxu0 }
  0xfb   : > { %v1107_v56 = vadd.f32 %v1106_v55, %v1105_v53  ;;  %v1128_v57 = vpop.f32.mrf.mxu1 }
  0xfc   : > { %v1108_v58 = vpop.f32.mrf.mxu0  ;;  %v1129_v59 = vadd.f32 %v1128_v57, %v1127_v54 }
  0xfd   : > { %v1130_v61 = vpop.f32.mrf.mxu1 }
  0xfe   : > { %v1109_v62 = vpop.f32.mrf.mxu0  ;;  %v789_v63 = vadd.f32 %v1129_v59, %v1107_v56  ;;  %799 = sbr.rel (%p1076_p6) target bundleno = 657 (0x291), region = 56 }
  0xff   : > { %v1131_v0 = vpop.f32.mrf.mxu1 }
 0x100   : > { %v794_v1 = vadd.f32 %v789_v63, %v441_v60 }
 0x102   : > { %795 = vst [vmem:[#allocation3] sm:$0xff] %v794_v1 }
 0x103   : > { %v1212_v2 = vld [vmem:[%s1411_s5 + $0x38] sm:$0xff]   ;;  %v1235_v3 = vmov 0.0   ;;  %v1213_v4 = vld [vmem:[%s1411_s5 + $0x30] sm:$0xff]   ;;  %vm1236_vm0 = vmmov 0   ;;  %v1214_v5 = vld [vmem:[%s1411_s5 + $0x28] sm:$0xff]   ;;  %v924_v16 = vand.u32 127, %v418_v34 }
 0x104   : > { %1142 = vmatprep.subr.bf16.mxu0 %v1235_v3  ;;  %1158 = vmatprep.mubr.msk.bf16.mxu0 %vm1236_vm0, %v1235_v3  ;;  %v1215_v6 = vld [vmem:[%s1411_s5 + $0x20] sm:$0xff]   ;;  %v1216_v7 = vld [vmem:[%s1411_s5 + $0x18] sm:$0xff]   ;;  %v1217_v8 = vld [vmem:[%s1411_s5 + $0x10] sm:$0xff]   ;;  %vm937_vm2 = vcmask 1041408  }
 0x105   : > { %1143 = vmatpush3.bf16.msra.mxu0 %v1212_v2  ;;  %v1077_v10 = vld [vmem:[%s1410_s4] ss:$0 sm:$0xff]  ;;  %v1218_v12 = vld [vmem:[%s1411_s5 + $0x8] sm:$0xff]   ;;  %vm925_vm1 = vcmp.lt.s32.totalorder %v924_v16, 64 }
 0x106   : > { %1144 = vmatprep.subr.bf16.mxu0 %v1235_v3  ;;  %v1219_v14 = vld [vmem:[%s1411_s5] sm:$0xff]   ;;  %v926_v24 = vsel %vm925_vm1, 1e-06, %v1235_v3 }
 0x107   : > { %v1078_v17 = vld [vmem:[%s1412_s6] ss:$0 sm:$0xff] }
 0x109   : > { %1145 = vmatpush3.bf16.msra.mxu0 %v1213_v4  ;;  %v800_v9 = vld [vmem:[#allocation3] sm:$0xff] }
 0x10a   : > { %1146 = vmatprep.subr.bf16.mxu0 %v1235_v3  ;;  %v808_v11 = vadd.f32 %v1077_v10, %v800_v9 }
 0x10c   : > { %v809_v13 = vmax.f32 %v808_v11, 0.0 }
 0x10d   : > { %1147 = vmatpush3.bf16.msra.mxu0 %v1214_v5 }
 0x10e   : > { %1148 = vmatprep.subr.bf16.mxu0 %v1235_v3  ;;  %v810_v15 = vpack.c.bf16 %v809_v13, %v809_v13 }
 0x111   : > { %1149 = vmatpush3.bf16.msra.mxu0 %v1215_v6 }
 0x112   : > { %1150 = vmatprep.subr.bf16.mxu0 %v1235_v3 }
 0x115   : > { %1151 = vmatpush3.bf16.msra.mxu0 %v1216_v7 }
 0x116   : > { %1152 = vmatprep.subr.bf16.mxu0 %v1235_v3 }
 0x119   : > { %1153 = vmatpush3.bf16.msra.mxu0 %v1217_v8 }
 0x11a   : > { %1154 = vmatprep.subr.bf16.mxu0 %v1235_v3 }
 0x11d   : > { %1155 = vmatpush3.bf16.msra.mxu0 %v1218_v12 }
 0x11e   : > { %1156 = vmatprep.subr.bf16.mxu0 %v1235_v3 }
 0x121   : > { %1157 = vmatpush3.bf16.msra.mxu0 %v1219_v14 }
 0x124   : > { %1159 = vmatmul.mubr.bf16.vlgmr.msra.gmra.mxu0 %v810_v15 }
 0x1e4   : > { %v916_v18 = vpop.f32.mrf.mxu0 }
 0x1e5   : > { %v917_v19 = vadd.f32 %v1078_v17, %v916_v18 }
 0x1e6   : > { %v1160_v20 = vpop.f32.mrf.mxu0 }
 0x1e7   : > { %922 = vst [vmem:[%s1413_s7] sm:$0xff] %v917_v19  ;;  %v928_v21 = vrot.slane %v917_v19, 2  ;;  %v932_v22 = vrot.slane %v917_v19, 4 }
 0x1e8   : > { %v919_v23 = vpop.f32.mrf.mxu0 }
 0x1e9   : > { %v930_v25 = vsub.f32 %v917_v19, %v928_v21  ;;  %v934_v26 = vsub.f32 %v917_v19, %v932_v22 }
 0x1ea   : > { %v1161_v27 = vpop.f32.mrf.mxu0 }
 0x1eb   : > { %v931_v28 = vadd.f32 %v930_v25, %v926_v24  ;;  %v935_v29 = vadd.f32 %v934_v26, %v926_v24 }
 0x1ed   : > { %v936_v30 = vmul.f32 %v931_v28, %v931_v28  ;;  %v948_v32 = vmul.f32 %v935_v29, %v935_v29 }
 0x1ef   : > { %v938_v31 = vsel %vm937_vm2, %v936_v30, 0.0  ;;  %v949_v33 = vsel %vm937_vm2, %v948_v32, 0.0 }
 0x1f0   : > { %939 = vadd.xlane.f32.xlu0 %v938_v31 }
 0x1f4   : > { %950 = vadd.xlane.f32.xlu0 %v949_v33 }
 0x279   : > { %v940_v34 = vpop.xlane.xlu0 %939 }
 0x27a   : > { %1220 = vrsqrt.f32 %v940_v34  ;;  %vm943_vm3 = vcmp.eq.f32.partialorder %v940_v34, inf  ;;  %v946_v38 = vand.u32 2147483648, %v940_v34  ;;  %vm945_vm4 = vcmp.eq.f32.partialorder %v940_v34, 0.0 }
 0x27d   : > { %v951_v35 = vpop.xlane.xlu0 %950 }
 0x27e   : > { %1222 = vrsqrt.f32 %v951_v35  ;;  %vm954_vm5 = vcmp.eq.f32.partialorder %v951_v35, inf  ;;  %v957_v43 = vand.u32 2147483648, %v951_v35  ;;  %vm956_vm6 = vcmp.eq.f32.partialorder %v951_v35, 0.0 }
 0x287   : > { %v1221_v36 = vpop.eup %1220 }
 0x288   : > { %v942_v37 = vmul.f32 %v1221_v36, %v940_v34 }
 0x28a   : > { %v944_v39 = vsel %vm943_vm3, %v940_v34, %v942_v37 }
 0x28b   : > { %v1223_v40 = vpop.eup %1222  ;;  %v947_v41 = vsel %vm945_vm4, %v946_v38, %v944_v39 }
 0x28c   : > { %959 = vst [vmem:[%s1414_s8] sm:$0x3] %v947_v41  ;;  %v953_v42 = vmul.f32 %v1223_v40, %v951_v35 }
 0x28e   : > { %v955_v44 = vsel %vm954_vm5, %v951_v35, %v953_v42 }
 0x28f   : > { %v958_v45 = vsel %vm956_vm6, %v957_v43, %v955_v44 }
 0x290   : > { %960 = vst [vmem:[%s1414_s8 + $0x2] sm:$0x3] %v958_v45 }
 0x291 PF: > { %s19_s27 = sadd.s32 1, %s1230_s27  }
 0x292   : > { %p16_p7 = scmp.ge.s32.totalorder %s19_s27, 4  }
 0x294   :  { %18 = sbr.rel (!%p16_p7) target bundleno = 1 (0x1), region = 99 }

</bundles_post_ra>
